<compile_context>
chip_gen: v5e
topology: v5e:2x2
jax: 0.10.0
libtpu: 0.0.40
codegen_flags: <defaults>
</compile_context>

<pallas_src>
import functools
import math

import jax
import jax.numpy as jnp
from jax.experimental import pallas as pl
from jax.experimental.pallas import tpu as pltpu


def _round_up(x: int, m: int) -> int:
    return ((x + m - 1) // m) * m


# ---------------------------------------------------------------------------
# Phase 1 kernel: fused dual linear layer.
#   x_ref  : [TM, F_in_p]     w_ref : [F_in_p, 2*F_p]     b_ref : [1, 2*F_p]
#   out_ref: [TM, 2*F_p]  =  x @ w + b   ( == [support_1 | support_2] )
def _fused_linear_kernel(x_ref, w_ref, b_ref, out_ref):
    out_ref[...] = (
        jnp.dot(x_ref[...], w_ref[...], preferred_element_type=jnp.float32)
        + b_ref[...]
    ).astype(out_ref.dtype)


# ---------------------------------------------------------------------------
# Phase 2 kernel: tiled neighborhood aggregation with a resident accumulator.
#   adj_ref: [TM, TK] (bf16)   s2_ref: [TK, F_p]   s1_ref: [TM, F_p]
#   out_ref: [TM, F_p]         acc_ref: [TM, F_p] f32 scratch
def _aggregate_kernel(adj_ref, s2_ref, s1_ref, out_ref, acc_ref):
    k = pl.program_id(1)

    @pl.when(k == 0)
    def _init():
        acc_ref[...] = s1_ref[...]          # start from support_1

    acc_ref[...] += jnp.dot(
        adj_ref[...].astype(jnp.float32), s2_ref[...],
        preferred_element_type=jnp.float32)

    @pl.when(k == pl.num_programs(1) - 1)
    def _finalize():
        out_ref[...] = acc_ref[...].astype(out_ref.dtype)


def new_convolution(x, adj, w1, b1, w2, b2, *, tile=512, adj_bf16=True):
    """Pallas forward of NewConvolution.

    x  : [N, F_in] float32          adj: [N, N] float (0/1 adjacency)
    w1 : [F_out, F_in]  b1: [F_out] w2 : [F_out, F_in]  b2: [F_out]
    returns [N, F_out] float32
    """
    n, f_in = x.shape
    f_out = w1.shape[0]

    f_in_p = _round_up(f_in, 128)
    f_p = _round_up(f_out, 128)
    tile = min(tile, _round_up(n, 128))
    n_p = _round_up(n, tile)
    n_blk = n_p // tile

    # ---- wrapper-side packing / zero-padding (cheap glue; for repeated calls
    #      with the same parameters, hoist & cache the packed w12/b12/adj).
    x_p = jnp.pad(x.astype(jnp.float32), ((0, n_p - n), (0, f_in_p - f_in)))
    adj_p = jnp.pad(adj, ((0, n_p - n), (0, n_p - n)))
    adj_p = adj_p.astype(jnp.bfloat16 if adj_bf16 else jnp.float32)

    w1_t = jnp.pad(w1.astype(jnp.float32).T,
                   ((0, f_in_p - f_in), (0, f_p - f_out)))
    w2_t = jnp.pad(w2.astype(jnp.float32).T,
                   ((0, f_in_p - f_in), (0, f_p - f_out)))
    w12 = jnp.concatenate([w1_t, w2_t], axis=1)            # [F_in_p, 2*F_p]
    b12 = jnp.concatenate([
        jnp.pad(b1.astype(jnp.float32), (0, f_p - f_out)),
        jnp.pad(b2.astype(jnp.float32), (0, f_p - f_out)),
    ]).reshape(1, 2 * f_p)

    vmem_limit = 48 * 1024 * 1024     # fits v7x's 64 MiB VMEM with headroom

    # ---- phase 1: s12 = x @ w12 + b12   (rows tiled, weights pinned)
    s12 = pl.pallas_call(
        _fused_linear_kernel,
        out_shape=jax.ShapeDtypeStruct((n_p, 2 * f_p), jnp.float32),
        grid_spec=pltpu.PrefetchScalarGridSpec(
            num_scalar_prefetch=0,
            grid=(n_blk,),
            in_specs=[
                pl.BlockSpec((tile, f_in_p), lambda i: (i, 0)),
                pl.BlockSpec((f_in_p, 2 * f_p), lambda i: (0, 0)),  # pinned
                pl.BlockSpec((1, 2 * f_p), lambda i: (0, 0)),       # pinned
            ],
            out_specs=pl.BlockSpec((tile, 2 * f_p), lambda i: (i, 0)),
        ),
        compiler_params=pltpu.CompilerParams(
            dimension_semantics=("parallel",),
            vmem_limit_bytes=vmem_limit,
        ),
        cost_estimate=pl.CostEstimate(
            flops=2 * n_p * f_in_p * (2 * f_p),
            transcendentals=0,
            bytes_accessed=int(x_p.size * 4 + w12.size * 4 + n_p * 2 * f_p * 4),
        ),
    )(x_p, w12, b12)

    # ---- phase 2: out = adj @ support_2 + support_1
    out_p = pl.pallas_call(
        _aggregate_kernel,
        out_shape=jax.ShapeDtypeStruct((n_p, f_p), jnp.float32),
        grid_spec=pltpu.PrefetchScalarGridSpec(
            num_scalar_prefetch=0,
            grid=(n_blk, n_blk),                  # (output rows, reduction)
            in_specs=[
                pl.BlockSpec((tile, tile), lambda i, k: (i, k)),   # adj tile
                pl.BlockSpec((tile, f_p), lambda i, k: (k, 1)),    # support_2
                pl.BlockSpec((tile, f_p), lambda i, k: (i, 0)),    # support_1
            ],
            out_specs=pl.BlockSpec((tile, f_p), lambda i, k: (i, 0)),
            scratch_shapes=[pltpu.VMEM((tile, f_p), jnp.float32)],
        ),
        compiler_params=pltpu.CompilerParams(
            dimension_semantics=("parallel", "arbitrary"),
            vmem_limit_bytes=vmem_limit,
        ),
        cost_estimate=pl.CostEstimate(
            flops=2 * n_p * n_p * f_p,
            transcendentals=0,
            bytes_accessed=int(n_p * n_p * adj_p.dtype.itemsize
                               + (n_blk + 1) * n_p * f_p * 4
                               + n_p * f_p * 4),
        ),
    )(adj_p, s12, s12)

    return out_p[:n, :f_out]


def _reference(x, adj, w1, b1, w2, b2):
    hp = jax.lax.Precision.HIGHEST
    s1 = jnp.dot(x, w1.T, precision=hp) + b1
    s2 = jnp.dot(x, w2.T, precision=hp) + b2
    return jnp.dot(adj, s2, precision=hp) + s1


if __name__ == "__main__":
    # Small, module-consistent shapes: N nodes, in_features -> out_features.
    # N deliberately not a multiple of 128 to exercise the padding path, and
    # tile=128 so the phase-2 grid is (2, 2) -> accumulator init/finalize runs.
    N, F_IN, F_OUT = 200, 32, 48

    key = jax.random.PRNGKey(0)
    kx, kadj, kw1, kb1, kw2, kb2 = jax.random.split(key, 6)

    x = jax.random.normal(kx, (N, F_IN), dtype=jnp.float32)
    adj = (jax.random.uniform(kadj, (N, N)) < 0.2).astype(jnp.float32)

    # Parameter init mirroring the module: U(-stdv, stdv), stdv = 1/sqrt(F_in).
    stdv = 1.0 / math.sqrt(F_IN)
    w1 = jax.random.uniform(kw1, (F_OUT, F_IN), minval=-stdv, maxval=stdv,
                            dtype=jnp.float32)
    b1 = jax.random.uniform(kb1, (F_OUT,), minval=-stdv, maxval=stdv,
                            dtype=jnp.float32)
    w2 = jax.random.uniform(kw2, (F_OUT, F_IN), minval=-stdv, maxval=stdv,
                            dtype=jnp.float32)
    b2 = jax.random.uniform(kb2, (F_OUT,), minval=-stdv, maxval=stdv,
                            dtype=jnp.float32)

    conv = jax.jit(functools.partial(new_convolution, tile=128, adj_bf16=True))
    out = jax.block_until_ready(conv(x, adj, w1, b1, w2, b2))

    ref = _reference(x, adj, w1, b1, w2, b2)
    assert out.shape == (N, F_OUT)
    assert jnp.allclose(out, ref, atol=1e-3, rtol=1e-3), "mismatch vs reference"

    print("KERNEL_OK")
</pallas_src>

<mosaic_0001>
module attributes {stable_mosaic.version = 11 : i64} {
  func.func @_fused_linear_kernel(%arg0: i32, %arg1: memref<128x128xf32, #tpu.memory_space<vmem>>, %arg2: memref<128x256xf32, #tpu.memory_space<vmem>>, %arg3: memref<1x256xf32, #tpu.memory_space<vmem>>, %arg4: memref<128x256xf32, #tpu.memory_space<vmem>>) attributes {dimension_semantics = [#tpu.dimension_semantics<parallel>], iteration_bounds = array<i64: 2>, scalar_prefetch = 0 : i64, scratch_operands = 0 : i64, tpu.core_type = #tpu.core_type<tc>, window_params = [{transform_indices = @transform_0, window_bounds = array<i64: 128, 128>}, {pipeline_mode = #tpu.pipeline_mode<synchronous>, transform_indices = @transform_1, window_bounds = array<i64: 128, 256>}, {pipeline_mode = #tpu.pipeline_mode<synchronous>, transform_indices = @transform_2, window_bounds = array<i64: 1, 256>}, {transform_indices = @transform_3, window_bounds = array<i64: 128, 256>}]} {
    %c0 = arith.constant 0 : index
    %c0_0 = arith.constant 0 : index
    %0 = vector.load %arg1[%c0, %c0_0] : memref<128x128xf32, #tpu.memory_space<vmem>>, vector<128x128xf32>
    %c0_1 = arith.constant 0 : index
    %c0_2 = arith.constant 0 : index
    %1 = vector.load %arg2[%c0_1, %c0_2] : memref<128x256xf32, #tpu.memory_space<vmem>>, vector<128x256xf32>
    %cst = arith.constant dense<0.000000e+00> : vector<128x256xf32>
    %2 = tpu.matmul %0, %1, %cst {dimension_numbers = #tpu.dot_dimension_numbers<[1], [0], [0], [1], [0, 0, 1, 1], [], []>} : vector<128x128xf32>, vector<128x256xf32>, vector<128x256xf32> -> vector<128x256xf32>
    %c0_3 = arith.constant 0 : index
    %c0_4 = arith.constant 0 : index
    %3 = vector.load %arg3[%c0_3, %c0_4] : memref<1x256xf32, #tpu.memory_space<vmem>>, vector<1x256xf32>
    %4 = vector.broadcast %3 : vector<1x256xf32> to vector<128x256xf32>
    %5 = arith.addf %2, %4 : vector<128x256xf32>
    %c0_5 = arith.constant 0 : index
    %c0_6 = arith.constant 0 : index
    %6 = vector.load %arg4[%c0_5, %c0_6] : memref<128x256xf32, #tpu.memory_space<vmem>>, vector<128x256xf32>
    tpu.vector_store %arg4[%c0_5, %c0_6], %5 {strides = array<i32>} : memref<128x256xf32, #tpu.memory_space<vmem>>, vector<128x256xf32>,
    return
  }
  func.func @transform_0(%arg0: i32) -> (i32, i32) {
    %c0_i32 = arith.constant 0 : i32
    %c0_i32_0 = arith.constant 0 : i32
    return %arg0, %c0_i32 : i32, i32
  }
  func.func @transform_1(%arg0: i32) -> (i32, i32) {
    %c0_i32 = arith.constant 0 : i32
    %c0_i32_0 = arith.constant 0 : i32
    %c0_i32_1 = arith.constant 0 : i32
    return %c0_i32, %c0_i32_0 : i32, i32
  }
  func.func @transform_2(%arg0: i32) -> (i32, i32) {
    %c0_i32 = arith.constant 0 : i32
    %c0_i32_0 = arith.constant 0 : i32
    %c0_i32_1 = arith.constant 0 : i32
    return %c0_i32, %c0_i32_0 : i32, i32
  }
  func.func @transform_3(%arg0: i32) -> (i32, i32) {
    %c0_i32 = arith.constant 0 : i32
    %c0_i32_0 = arith.constant 0 : i32
    return %arg0, %c0_i32 : i32, i32
  }
}

module attributes {stable_mosaic.version = 11 : i64} {
  func.func @_aggregate_kernel(%arg0: i32, %arg1: i32, %arg2: memref<128x128xbf16, #tpu.memory_space<vmem>>, %arg3: memref<128x128xf32, #tpu.memory_space<vmem>>, %arg4: memref<128x128xf32, #tpu.memory_space<vmem>>, %arg5: memref<128x128xf32, #tpu.memory_space<vmem>>, %arg6: memref<128x128xf32, #tpu.memory_space<vmem>>) attributes {dimension_semantics = [#tpu.dimension_semantics<parallel>, #tpu.dimension_semantics<arbitrary>], iteration_bounds = array<i64: 2, 2>, scalar_prefetch = 0 : i64, scratch_operands = 1 : i64, tpu.core_type = #tpu.core_type<tc>, window_params = [{transform_indices = @transform_0, window_bounds = array<i64: 128, 128>}, {transform_indices = @transform_1, window_bounds = array<i64: 128, 128>}, {transform_indices = @transform_2, window_bounds = array<i64: 128, 128>}, {transform_indices = @transform_3, window_bounds = array<i64: 128, 128>}]} {
    %c0_i32 = arith.constant 0 : i32
    %0 = arith.cmpi eq, %arg1, %c0_i32 : i32
    %1 = arith.extui %0 : i1 to i32
    %c0_i32_0 = arith.constant 0 : i32
    %2 = arith.cmpi ne, %1, %c0_i32_0 : i32
    scf.if %2 {
      %c0_9 = arith.constant 0 : index
      %c0_10 = arith.constant 0 : index
      %13 = vector.load %arg4[%c0_9, %c0_10] : memref<128x128xf32, #tpu.memory_space<vmem>>, vector<128x128xf32>
      %c0_11 = arith.constant 0 : index
      %c0_12 = arith.constant 0 : index
      %14 = vector.load %arg6[%c0_11, %c0_12] : memref<128x128xf32, #tpu.memory_space<vmem>>, vector<128x128xf32>
      tpu.vector_store %arg6[%c0_11, %c0_12], %13 {strides = array<i32>} : memref<128x128xf32, #tpu.memory_space<vmem>>, vector<128x128xf32>,
    } else {
    }
    %c0 = arith.constant 0 : index
    %c0_1 = arith.constant 0 : index
    %3 = vector.load %arg6[%c0, %c0_1] : memref<128x128xf32, #tpu.memory_space<vmem>>, vector<128x128xf32>
    %c0_2 = arith.constant 0 : index
    %c0_3 = arith.constant 0 : index
    %4 = vector.load %arg2[%c0_2, %c0_3] : memref<128x128xbf16, #tpu.memory_space<vmem>>, vector<128x128xbf16>
    %5 = arith.extf %4 : vector<128x128xbf16> to vector<128x128xf32>
    %c0_4 = arith.constant 0 : index
    %c0_5 = arith.constant 0 : index
    %6 = vector.load %arg3[%c0_4, %c0_5] : memref<128x128xf32, #tpu.memory_space<vmem>>, vector<128x128xf32>
    %cst = arith.constant dense<0.000000e+00> : vector<128x128xf32>
    %7 = tpu.matmul %5, %6, %cst {dimension_numbers = #tpu.dot_dimension_numbers<[1], [0], [0], [1], [0, 0, 1, 1], [], []>} : vector<128x128xf32>, vector<128x128xf32>, vector<128x128xf32> -> vector<128x128xf32>
    %8 = arith.addf %3, %7 : vector<128x128xf32>
    %c0_6 = arith.constant 0 : index
    %c0_7 = arith.constant 0 : index
    %9 = vector.load %arg6[%c0_6, %c0_7] : memref<128x128xf32, #tpu.memory_space<vmem>>, vector<128x128xf32>
    tpu.vector_store %arg6[%c0_6, %c0_7], %8 {strides = array<i32>} : memref<128x128xf32, #tpu.memory_space<vmem>>, vector<128x128xf32>,
    %c1_i32 = arith.constant 1 : i32
    %10 = arith.cmpi eq, %arg1, %c1_i32 : i32
    %11 = arith.extui %10 : i1 to i32
    %c0_i32_8 = arith.constant 0 : i32
    %12 = arith.cmpi ne, %11, %c0_i32_8 : i32
    scf.if %12 {
      %c0_9 = arith.constant 0 : index
      %c0_10 = arith.constant 0 : index
      %13 = vector.load %arg6[%c0_9, %c0_10] : memref<128x128xf32, #tpu.memory_space<vmem>>, vector<128x128xf32>
      %c0_11 = arith.constant 0 : index
      %c0_12 = arith.constant 0 : index
      %14 = vector.load %arg5[%c0_11, %c0_12] : memref<128x128xf32, #tpu.memory_space<vmem>>, vector<128x128xf32>
      tpu.vector_store %arg5[%c0_11, %c0_12], %13 {strides = array<i32>} : memref<128x128xf32, #tpu.memory_space<vmem>>, vector<128x128xf32>,
    } else {
    }
    return
  }
  func.func @transform_0(%arg0: i32, %arg1: i32) -> (i32, i32) {
    %c0_i32 = arith.constant 0 : i32
    return %arg0, %arg1 : i32, i32
  }
  func.func @transform_1(%arg0: i32, %arg1: i32) -> (i32, i32) {
    %c1_i32 = arith.constant 1 : i32
    %c0_i32 = arith.constant 0 : i32
    return %arg1, %c1_i32 : i32, i32
  }
  func.func @transform_2(%arg0: i32, %arg1: i32) -> (i32, i32) {
    %c0_i32 = arith.constant 0 : i32
    %c0_i32_0 = arith.constant 0 : i32
    return %arg0, %c0_i32 : i32, i32
  }
  func.func @transform_3(%arg0: i32, %arg1: i32) -> (i32, i32) {
    %c0_i32 = arith.constant 0 : i32
    %c0_i32_0 = arith.constant 0 : i32
    return %arg0, %c0_i32 : i32, i32
  }
}

</mosaic_0001>

<bundles_post_ra>
// kernel: new_convolution.3
= control target key start
LH: loop header
LB: loop body
LE: loop exit
PB: predicated region body
PF: predicated region fallthrough
CT: control target
= control target key end

     0   :  { %s1493_s0 = inlined_call_operand.vmem [shape: bf16[256,256], index: 0, kind: input, shape index: {}]   ;;  %s1494_s1 = inlined_call_operand.vmem [shape: f32[256,256], index: 1, kind: input, shape index: {}, may-alias: {1,2}]   ;;  %s1495_s2 = inlined_call_operand.vmem [shape: f32[256,256], index: 2, kind: input, shape index: {}, may-alias: {1,2}]   ;;  %s1496_s3 = inlined_call_operand.vmem [shape: f32[256,128], index: 3, kind: output, shape index: {}]  }
   0x1   :  { %1497 = sst [smem:[#allocation6_spill]] %s1493_s0 }
   0x2   :  { %1498 = sst [smem:[#allocation7_spill]] %s1494_s1 }
   0x3   :  { %1499 = sst [smem:[#allocation8_spill]] %s1495_s2 }
   0x4   :  { %s1205_s12 = smov 0   ;;  %s1207_s13 = smov 0  }
   0x5   :  { %s1209_s14 = smov 0   ;;  %s1211_s15 = smov 0  }
   0x6   :  { %s1213_s16 = smov 0   ;;  %s1215_s17 = smov 0  }
   0x7   :  { %s1217_s18 = smov 0   ;;  %s1219_s19 = smov 0  }
   0x8   :  { %s1221_s20 = smov 0   ;;  %s1223_s21 = smov 0  }
   0x9   :  { %s1225_s22 = smov 0  }
   0xa LB: > { %s22_s23 = sadd.s32 1, %s1175_s20  ;;  %s25_s24 = sadd.s32 1, %s1179_s21  ;;  %s1183_s22 = sphi %s1225_s22, %s13_s22   ;;  %s1179_s21 = sphi %s1223_s21, %s1515_s21   ;;  %s1175_s20 = sphi %s1221_s20, %s1514_s20   ;;  %s1171_s19 = sphi %s1219_s19, %s1513_s19   ;;  %s1167_s18 = sphi %s1217_s18, %s1512_s18   ;;  %s1163_s17 = sphi %s1215_s17, %s1511_s17   ;;  %s1159_s16 = sphi %s1213_s16, %s1510_s16   ;;  %s1155_s15 = sphi %s1211_s15, %s1509_s15   ;;  %s1151_s14 = sphi %s1209_s14, %s1508_s14   ;;  %s1147_s13 = sphi %s1207_s13, %s1507_s13   ;;  %s1143_s12 = sphi %s1205_s12, %s1506_s12  }
   0xb   : > { %p23_p0 = scmp.ge.s32.totalorder %s22_s23, 2  ;;  %s34_s25 = sadd.s32 1, %s1163_s17 }
   0xc   : > { %p41_p1 = scmp.ne.s32.totalorder %s1163_s17, %s1159_s16  ;;  %p42_p2 = scmp.eq.s32.totalorder %s1183_s22, 0 }
   0xd   : > { %s1517_s23 = smov (%p23_p0, %s22_s23), 0  ;;  %s1519_s24 = smov (!%p23_p0, %s25_s24), %s1179_s21 }
   0xe   : > { %s30_s26 = ssub.s32 %s1175_s20, %s1517_s23  ;;  %p1273_p3 = por %p42_p2, %p41_p1 }
   0xf   : > { %p27_p4 = scmp.ge.s32.totalorder %s1519_s24, 2  ;;  %p58_p5 = scmp.eq.s32.totalorder %s30_s26, 0 }
  0x10   : > { %s60_s28 = sadd.s32 1, %s1155_s15  ;;  %p67_p6 = scmp.ne.s32.totalorder %s1155_s15, %s1151_s14 }
  0x11   : > { %s1521_s24 = smov (%p27_p4, %s1519_s24), 0  ;;  %s86_s6 = sadd.s32 1, %s1147_s13 }
  0x12   : > { %s1283_s29 = scalar_select %p58_p5, %s1155_s15, %s60_s28  }
  0x13   : > { %s29_s30 = ssub.s32 %s1179_s21, %s1521_s24  ;;  %p1289_p7 = por %p67_p6, %p42_p2 }
  0x14   : > { %s31_s5 = sor.u32 %s30_s26, %s29_s30  ;;  %p84_p8 = scmp.eq.s32.totalorder %s29_s30, 0 }
  0x15   : > { %p32_p9 = scmp.eq.s32.totalorder %s31_s5, 0  ;;  %p93_p10 = scmp.ne.s32.totalorder %s1147_s13, %s1143_s12 }
  0x16   : > { %s1295_s7 = scalar_select %p84_p8, %s1147_s13, %s86_s6  }
  0x17   : > { %s1298_s8 = scalar_select %p32_p9, %s1163_s17, %s34_s25  }
  0x18   : > { %p1304_p11 = por %p93_p10, %p42_p2  ;;  %p880_p12 = scmp.ge.s32.totalorder %s1183_s22, 4 }
  0x1a   : > { %145 = sbr.rel (%p880_p12) target bundleno = 109 (0x6d), region = 16 }
  0x1f   : > { %148 = sbr.rel (!%p1273_p3) target bundleno = 57 (0x39), region = 20  ;;  %s150_s10 = sand.u32 (%p1273_p3), 1, %s1163_s17  }
  0x20   : > { %s918_s11 = sshll.u32 (%p1273_p3), %s1179_s21, 5  ;;  %s881_s26 = sshll.u32 (%p1273_p3), %s150_s10, 6 }
  0x21   : > { %s155_s25 = sadd.s32 (%p1273_p3), %s1175_s20, %s918_s11  ;;  %s1503_s0 = sld [smem:[#allocation6_spill]] (%p1273_p3) }
  0x22   : > { %s884_s28 = sshll.u32 (%p1273_p3), %s155_s25, 2  ;;  %s152_s27 = scalar_lea.vmem (%p1273_p3), [#allocation3], %s881_s26 }
  0x27   : > { %s1317_s6 = scalar_lea.vmem %s1503_s0, %s884_s28 }
  0x28   : > { %v174_v0 = vld [vmem:[%s1317_s6] sm:$0xf]  ;;  %v176_v1 = vld [vmem:[%s1317_s6 + $0x8] sm:$0xf]  ;;  %v178_v2 = vld [vmem:[%s1317_s6 + $0x10] sm:$0xf] }
  0x29   : > { %175 = vst [vmem:[%s152_s27] sm:$0xf] %v174_v0  ;;  %v180_v3 = vld [vmem:[%s1317_s6 + $0x18] sm:$0xf]  ;;  %v182_v4 = vld [vmem:[%s1317_s6 + $0x20] sm:$0xf] }
  0x2a   : > { %177 = vst [vmem:[%s152_s27 + $0x4] sm:$0xf] %v176_v1  ;;  %v184_v5 = vld [vmem:[%s1317_s6 + $0x28] sm:$0xf]  ;;  %v186_v6 = vld [vmem:[%s1317_s6 + $0x30] sm:$0xf] }
  0x2b   : > { %179 = vst [vmem:[%s152_s27 + $0x8] sm:$0xf] %v178_v2  ;;  %v188_v7 = vld [vmem:[%s1317_s6 + $0x38] sm:$0xf]  ;;  %v190_v8 = vld [vmem:[%s1317_s6 + $0x40] sm:$0xf] }
  0x2c   : > { %181 = vst [vmem:[%s152_s27 + $0xc] sm:$0xf] %v180_v3  ;;  %v192_v9 = vld [vmem:[%s1317_s6 + $0x48] sm:$0xf]  ;;  %v194_v10 = vld [vmem:[%s1317_s6 + $0x50] sm:$0xf] }
  0x2d   : > { %183 = vst [vmem:[%s152_s27 + $0x10] sm:$0xf] %v182_v4  ;;  %v196_v11 = vld [vmem:[%s1317_s6 + $0x58] sm:$0xf]  ;;  %v198_v12 = vld [vmem:[%s1317_s6 + $0x60] sm:$0xf] }
  0x2e   : > { %185 = vst [vmem:[%s152_s27 + $0x14] sm:$0xf] %v184_v5  ;;  %v200_v13 = vld [vmem:[%s1317_s6 + $0x68] sm:$0xf]  ;;  %v202_v14 = vld [vmem:[%s1317_s6 + $0x70] sm:$0xf] }
  0x2f   : > { %187 = vst [vmem:[%s152_s27 + $0x18] sm:$0xf] %v186_v6  ;;  %v204_v15 = vld [vmem:[%s1317_s6 + $0x78] sm:$0xf] }
  0x30   : > { %189 = vst [vmem:[%s152_s27 + $0x1c] sm:$0xf] %v188_v7 }
  0x31   : > { %191 = vst [vmem:[%s152_s27 + $0x20] sm:$0xf] %v190_v8 }
  0x32   : > { %193 = vst [vmem:[%s152_s27 + $0x24] sm:$0xf] %v192_v9 }
  0x33   : > { %195 = vst [vmem:[%s152_s27 + $0x28] sm:$0xf] %v194_v10 }
  0x34   : > { %197 = vst [vmem:[%s152_s27 + $0x2c] sm:$0xf] %v196_v11 }
  0x35   : > { %199 = vst [vmem:[%s152_s27 + $0x30] sm:$0xf] %v198_v12 }
  0x36   : > { %201 = vst [vmem:[%s152_s27 + $0x34] sm:$0xf] %v200_v13 }
  0x37   : > { %203 = vst [vmem:[%s152_s27 + $0x38] sm:$0xf] %v202_v14 }
  0x38   : > { %205 = vst [vmem:[%s152_s27 + $0x3c] sm:$0xf] %v204_v15 }
  0x39 PF: > { %261 = sbr.rel (!%p1289_p7) target bundleno = 83 (0x53), region = 61  ;;  %s263_s10 = sand.u32 (%p1289_p7), 1, %s1155_s15  }
  0x3a   : > { %s919_s11 = sshll.u32 (%p1289_p7), %s1175_s20, 8  ;;  %s885_s26 = sshll.u32 (%p1289_p7), %s263_s10, 7 }
  0x3b   : > { %s1504_s1 = sld [smem:[#allocation7_spill]] (%p1289_p7)  ;;  %s265_s4 = scalar_lea.vmem (%p1289_p7), [#allocation4], %s885_s26 }
  0x41   : > { %s1342_s30 = scalar_lea.vmem %s1504_s1, %s919_s11 }
  0x42   : > { %v888_v16 = vld [vmem:[%s1342_s30 + $0x8] sm:$0xff]  ;;  %v889_v17 = vld [vmem:[%s1342_s30 + $0x18] sm:$0xff] }
  0x43   : > { %v890_v18 = vld [vmem:[%s1342_s30 + $0x28] sm:$0xff]  ;;  %330 = vst [vmem:[%s265_s4] sm:$0xff] %v888_v16  ;;  %v891_v19 = vld [vmem:[%s1342_s30 + $0x38] sm:$0xff] }
  0x44   : > { %332 = vst [vmem:[%s265_s4 + $0x8] sm:$0xff] %v889_v17  ;;  %v892_v20 = vld [vmem:[%s1342_s30 + $0x48] sm:$0xff]  ;;  %v893_v21 = vld [vmem:[%s1342_s30 + $0x58] sm:$0xff] }
  0x45   : > { %334 = vst [vmem:[%s265_s4 + $0x10] sm:$0xff] %v890_v18  ;;  %v894_v22 = vld [vmem:[%s1342_s30 + $0x68] sm:$0xff]  ;;  %v895_v23 = vld [vmem:[%s1342_s30 + $0x78] sm:$0xff] }
  0x46   : > { %336 = vst [vmem:[%s265_s4 + $0x18] sm:$0xff] %v891_v19  ;;  %v896_v24 = vld [vmem:[%s1342_s30 + $0x88] sm:$0xff]  ;;  %v897_v25 = vld [vmem:[%s1342_s30 + $0x98] sm:$0xff] }
  0x47   : > { %338 = vst [vmem:[%s265_s4 + $0x20] sm:$0xff] %v892_v20  ;;  %v898_v26 = vld [vmem:[%s1342_s30 + $0xa8] sm:$0xff]  ;;  %v899_v27 = vld [vmem:[%s1342_s30 + $0xb8] sm:$0xff] }
  0x48   : > { %340 = vst [vmem:[%s265_s4 + $0x28] sm:$0xff] %v893_v21  ;;  %v900_v28 = vld [vmem:[%s1342_s30 + $0xc8] sm:$0xff]  ;;  %v901_v29 = vld [vmem:[%s1342_s30 + $0xd8] sm:$0xff] }
  0x49   : > { %342 = vst [vmem:[%s265_s4 + $0x30] sm:$0xff] %v894_v22  ;;  %v902_v30 = vld [vmem:[%s1342_s30 + $0xe8] sm:$0xff]  ;;  %v903_v31 = vld [vmem:[%s1342_s30 + $0xf8] sm:$0xff] }
  0x4a   : > { %344 = vst [vmem:[%s265_s4 + $0x38] sm:$0xff] %v895_v23 }
  0x4b   : > { %346 = vst [vmem:[%s265_s4 + $0x40] sm:$0xff] %v896_v24 }
  0x4c   : > { %348 = vst [vmem:[%s265_s4 + $0x48] sm:$0xff] %v897_v25 }
  0x4d   : > { %350 = vst [vmem:[%s265_s4 + $0x50] sm:$0xff] %v898_v26 }
  0x4e   : > { %352 = vst [vmem:[%s265_s4 + $0x58] sm:$0xff] %v899_v27 }
  0x4f   : > { %354 = vst [vmem:[%s265_s4 + $0x60] sm:$0xff] %v900_v28 }
  0x50   : > { %356 = vst [vmem:[%s265_s4 + $0x68] sm:$0xff] %v901_v29 }
  0x51   : > { %358 = vst [vmem:[%s265_s4 + $0x70] sm:$0xff] %v902_v30 }
  0x52   : > { %360 = vst [vmem:[%s265_s4 + $0x78] sm:$0xff] %v903_v31 }
  0x53 PF: > { %366 = sbr.rel (!%p1304_p11) target bundleno = 109 (0x6d), region = 99  ;;  %s368_s5 = sand.u32 (%p1304_p11), 1, %s1147_s13  }
  0x54   : > { %s921_s6 = sshll.u32 (%p1304_p11), %s1179_s21, 8  ;;  %s904_s27 = sshll.u32 (%p1304_p11), %s368_s5, 7 }
  0x55   : > { %s1505_s2 = sld [smem:[#allocation8_spill]] (%p1304_p11)  ;;  %s370_s9 = scalar_lea.vmem (%p1304_p11), [#allocation5], %s904_s27 }
  0x5b   : > { %s1367_s26 = scalar_lea.vmem %s1505_s2, %s921_s6 }
  0x5c   : > { %v433_v32 = vld [vmem:[%s1367_s26] sm:$0xff]  ;;  %v435_v33 = vld [vmem:[%s1367_s26 + $0x10] sm:$0xff] }
  0x5d   : > { %v437_v34 = vld [vmem:[%s1367_s26 + $0x20] sm:$0xff]  ;;  %434 = vst [vmem:[%s370_s9] sm:$0xff] %v433_v32  ;;  %v439_v35 = vld [vmem:[%s1367_s26 + $0x30] sm:$0xff] }
  0x5e   : > { %436 = vst [vmem:[%s370_s9 + $0x8] sm:$0xff] %v435_v33  ;;  %v441_v36 = vld [vmem:[%s1367_s26 + $0x40] sm:$0xff]  ;;  %v443_v37 = vld [vmem:[%s1367_s26 + $0x50] sm:$0xff] }
  0x5f   : > { %438 = vst [vmem:[%s370_s9 + $0x10] sm:$0xff] %v437_v34  ;;  %v445_v38 = vld [vmem:[%s1367_s26 + $0x60] sm:$0xff]  ;;  %v447_v39 = vld [vmem:[%s1367_s26 + $0x70] sm:$0xff] }
  0x60   : > { %440 = vst [vmem:[%s370_s9 + $0x18] sm:$0xff] %v439_v35  ;;  %v449_v40 = vld [vmem:[%s1367_s26 + $0x80] sm:$0xff]  ;;  %v451_v41 = vld [vmem:[%s1367_s26 + $0x90] sm:$0xff] }
  0x61   : > { %442 = vst [vmem:[%s370_s9 + $0x20] sm:$0xff] %v441_v36  ;;  %v453_v42 = vld [vmem:[%s1367_s26 + $0xa0] sm:$0xff]  ;;  %v455_v43 = vld [vmem:[%s1367_s26 + $0xb0] sm:$0xff] }
  0x62   : > { %444 = vst [vmem:[%s370_s9 + $0x28] sm:$0xff] %v443_v37  ;;  %v457_v44 = vld [vmem:[%s1367_s26 + $0xc0] sm:$0xff]  ;;  %v459_v45 = vld [vmem:[%s1367_s26 + $0xd0] sm:$0xff] }
  0x63   : > { %446 = vst [vmem:[%s370_s9 + $0x30] sm:$0xff] %v445_v38  ;;  %v461_v46 = vld [vmem:[%s1367_s26 + $0xe0] sm:$0xff]  ;;  %v463_v47 = vld [vmem:[%s1367_s26 + $0xf0] sm:$0xff] }
  0x64   : > { %448 = vst [vmem:[%s370_s9 + $0x38] sm:$0xff] %v447_v39 }
  0x65   : > { %450 = vst [vmem:[%s370_s9 + $0x40] sm:$0xff] %v449_v40 }
  0x66   : > { %452 = vst [vmem:[%s370_s9 + $0x48] sm:$0xff] %v451_v41 }
  0x67   : > { %454 = vst [vmem:[%s370_s9 + $0x50] sm:$0xff] %v453_v42 }
  0x68   : > { %456 = vst [vmem:[%s370_s9 + $0x58] sm:$0xff] %v455_v43 }
  0x69   : > { %458 = vst [vmem:[%s370_s9 + $0x60] sm:$0xff] %v457_v44 }
  0x6a   : > { %460 = vst [vmem:[%s370_s9 + $0x68] sm:$0xff] %v459_v45 }
  0x6b   : > { %462 = vst [vmem:[%s370_s9 + $0x70] sm:$0xff] %v461_v46 }
  0x6c   : > { %464 = vst [vmem:[%s370_s9 + $0x78] sm:$0xff] %v463_v47 }
  0x6d PF: > { %p908_p13 = scmp.ge.s32.totalorder %s1183_s22, 1  ;;  %p469_p0 = scmp.lt.s32.totalorder %s1183_s22, 5 }
  0x6f   : > { %p470_p1 = pnand %p908_p13, %p469_p0 }
  0x70   : > { %s476_s25 = sand.u32 (!%p470_p1), 1, %s1159_s16   ;;  %s483_s28 = sand.u32 (!%p470_p1), 1, %s1151_s14  }
  0x71   : > { %473 = sbr.rel (%p470_p1) target bundleno = 351 (0x15f), region = 137  ;;  %s909_s30 = sshll.u32 (!%p470_p1), %s476_s25, 6 }
  0x72   : > { %s910_s4 = sshll.u32 (!%p470_p1), %s483_s28, 7  ;;  %s490_s5 = sand.u32 (!%p470_p1), 1, %s1143_s12  }
  0x73   : > { %s912_s6 = sshll.u32 (!%p470_p1), %s1171_s19, 4  ;;  %s911_s27 = sshll.u32 (!%p470_p1), %s490_s5, 7 }
  0x74   : > { %p525_p2 = scmp.lt.s32.totalorder (!%p470_p1), %s912_s6, 31  ;;  %s1396_s0 = scalar_lea.vmem (!%p470_p1), [#allocation3], %s909_s30 }
  0x75   : > { %s1398_s1 = scalar_lea.vmem (!%p470_p1), [#allocation4], %s910_s4  ;;  %s1400_s2 = scalar_lea.vmem (!%p470_p1), [#allocation5], %s911_s27 }
  0x76   : > { %s1523_s6 = smov (!%p525_p2, %s912_s6), 31  ;;  %p914_p3 = scmp.ne.s32.totalorder %s1167_s18, 0 }
  0x77   : > { %s913_s10 = sshll.u32 %s1523_s6, 3 }
  0x78   : > { %s1394_s9 = scalar_lea.vmem %s1496_s3, %s913_s10  ;;  %533 = sbr.rel (%p914_p3) target bundleno = 142 (0x8e), region = 153 }
  0x7d   : > { %v534_v48 = vld [vmem:[%s1400_s2] sm:$0xff]  ;;  %v535_v49 = vld [vmem:[%s1400_s2 + $0x8] sm:$0xff]  ;;  %v536_v50 = vld [vmem:[%s1400_s2 + $0x10] sm:$0xff] }
  0x7e   : > { %550 = vst [vmem:[#allocation2 + $0x30] sm:$0xff] %v534_v48  ;;  %v537_v51 = vld [vmem:[%s1400_s2 + $0x18] sm:$0xff]  ;;  %v538_v52 = vld [vmem:[%s1400_s2 + $0x20] sm:$0xff]  ;;  %v539_v53 = vld [vmem:[%s1400_s2 + $0x28] sm:$0xff] }
  0x7f   : > { %551 = vst [vmem:[#allocation2] sm:$0xff] %v535_v49  ;;  %v540_v54 = vld [vmem:[%s1400_s2 + $0x30] sm:$0xff]  ;;  %v541_v55 = vld [vmem:[%s1400_s2 + $0x38] sm:$0xff]  ;;  %v542_v56 = vld [vmem:[%s1400_s2 + $0x40] sm:$0xff] }
  0x80   : > { %552 = vst [vmem:[#allocation2 + $0x58] sm:$0xff] %v536_v50  ;;  %v543_v57 = vld [vmem:[%s1400_s2 + $0x48] sm:$0xff]  ;;  %v544_v58 = vld [vmem:[%s1400_s2 + $0x50] sm:$0xff]  ;;  %v545_v59 = vld [vmem:[%s1400_s2 + $0x58] sm:$0xff] }
  0x81   : > { %553 = vst [vmem:[#allocation2 + $0x18] sm:$0xff] %v537_v51  ;;  %v546_v60 = vld [vmem:[%s1400_s2 + $0x60] sm:$0xff]  ;;  %v547_v61 = vld [vmem:[%s1400_s2 + $0x68] sm:$0xff]  ;;  %v548_v62 = vld [vmem:[%s1400_s2 + $0x70] sm:$0xff] }
  0x82   : > { %554 = vst [vmem:[#allocation2 + $0x50] sm:$0xff] %v538_v52  ;;  %v549_v63 = vld [vmem:[%s1400_s2 + $0x78] sm:$0xff] }
  0x83   : > { %555 = vst [vmem:[#allocation2 + $0x68] sm:$0xff] %v539_v53 }
  0x84   : > { %556 = vst [vmem:[#allocation2 + $0x8] sm:$0xff] %v540_v54 }
  0x85   : > { %557 = vst [vmem:[#allocation2 + $0x48] sm:$0xff] %v541_v55 }
  0x86   : > { %558 = vst [vmem:[#allocation2 + $0x40] sm:$0xff] %v542_v56 }
  0x87   : > { %559 = vst [vmem:[#allocation2 + $0x20] sm:$0xff] %v543_v57 }
  0x88   : > { %560 = vst [vmem:[#allocation2 + $0x10] sm:$0xff] %v544_v58 }
  0x89   : > { %561 = vst [vmem:[#allocation2 + $0x38] sm:$0xff] %v545_v59 }
  0x8a   : > { %562 = vst [vmem:[#allocation2 + $0x60] sm:$0xff] %v546_v60 }
  0x8b   : > { %563 = vst [vmem:[#allocation2 + $0x70] sm:$0xff] %v547_v61 }
  0x8c   : > { %564 = vst [vmem:[#allocation2 + $0x78] sm:$0xff] %v548_v62 }
  0x8d   : > { %565 = vst [vmem:[#allocation2 + $0x28] sm:$0xff] %v549_v63 }
  0x8e PF: > { %v629_v0 = vld [vmem:[%s1398_s1 + $0x78] sm:$0xff]  ;;  %v628_v1 = vld [vmem:[%s1398_s1 + $0x70] sm:$0xff]  ;;  %v627_v2 = vld [vmem:[%s1398_s1 + $0x68] sm:$0xff]  ;;  %p915_p4 = scmp.ne.s32.totalorder %s1167_s18, 1 }
  0x8f   : > { %962 = vmatpush.msra.mxu2 %v629_v0  ;;  %963 = vmatpush.msra.mxu3 %v629_v0  ;;  %v626_v3 = vld [vmem:[%s1398_s1 + $0x60] sm:$0xff]  ;;  %v625_v4 = vld [vmem:[%s1398_s1 + $0x58] sm:$0xff]  ;;  %v624_v5 = vld [vmem:[%s1398_s1 + $0x50] sm:$0xff] }
  0x90   : > { %630 = vmatpush.msra.mxu0 %v629_v0  ;;  %961 = vmatpush.msra.mxu1 %v629_v0  ;;  %v623_v6 = vld [vmem:[%s1398_s1 + $0x48] sm:$0xff]  ;;  %v622_v7 = vld [vmem:[%s1398_s1 + $0x40] sm:$0xff]  ;;  %v621_v8 = vld [vmem:[%s1398_s1 + $0x38] sm:$0xff] }
  0x91   : > { %965 = vmatpush.msra.mxu2 %v628_v1  ;;  %966 = vmatpush.msra.mxu3 %v628_v1  ;;  %v620_v9 = vld [vmem:[%s1398_s1 + $0x30] sm:$0xff]  ;;  %v619_v10 = vld [vmem:[%s1398_s1 + $0x28] sm:$0xff]  ;;  %v618_v11 = vld [vmem:[%s1398_s1 + $0x20] sm:$0xff] }
  0x92   : > { %631 = vmatpush.msra.mxu0 %v628_v1  ;;  %964 = vmatpush.msra.mxu1 %v628_v1  ;;  %v617_v12 = vld [vmem:[%s1398_s1 + $0x18] sm:$0xff]  ;;  %v616_v13 = vld [vmem:[%s1398_s1 + $0x10] sm:$0xff]  ;;  %v957_v14 = vld [vmem:[%s1396_s0 + $0x20] sm:$0xff]  }
  0x93   : > { %968 = vmatpush.msra.mxu2 %v627_v2  ;;  %969 = vmatpush.msra.mxu3 %v627_v2  ;;  %v959_v15 = vld [vmem:[%s1396_s0 + $0x30] sm:$0xff]   ;;  %v615_v16 = vld [vmem:[%s1398_s1 + $0x8] sm:$0xff]  ;;  %v923_v17 = vld [vmem:[%s1396_s0] sm:$0xff]   ;;  %v940_v20 = vunpack.c.l.bf16 %v957_v14  ;;  %v941_v24 = vunpack.c.h.bf16 %v957_v14 }
  0x94   : > { %632 = vmatpush.msra.mxu0 %v627_v2  ;;  %967 = vmatpush.msra.mxu1 %v627_v2  ;;  %v955_v18 = vld [vmem:[%s1396_s0 + $0x10] sm:$0xff]   ;;  %v614_v19 = vld [vmem:[%s1398_s1] sm:$0xff]  ;;  %v948_v21 = vunpack.c.l.bf16 %v959_v15  ;;  %v924_v22 = vunpack.c.l.bf16 %v923_v17  ;;  %v949_v25 = vunpack.c.h.bf16 %v959_v15  ;;  %v925_v26 = vunpack.c.h.bf16 %v923_v17  ;;  %v958_v28 = vld [vmem:[%s1396_s0 + $0x28] sm:$0xff]  }
  0x95   : > { %971 = vmatpush.msra.mxu2 %v626_v3  ;;  %972 = vmatpush.msra.mxu3 %v626_v3  ;;  %v932_v23 = vunpack.c.l.bf16 %v955_v18  ;;  %v933_v27 = vunpack.c.h.bf16 %v955_v18  ;;  %v960_v29 = vld [vmem:[%s1396_s0 + $0x38] sm:$0xff]   ;;  %v954_v30 = vld [vmem:[%s1396_s0 + $0x8] sm:$0xff]   ;;  %v944_v32 = vunpack.c.l.bf16 %v958_v28  ;;  %v945_v36 = vunpack.c.h.bf16 %v958_v28  ;;  %v566_v40 = vld [vmem:[#allocation2 + $0x30] sm:$0xff] }
  0x96   : > { %633 = vmatpush.msra.mxu0 %v626_v3  ;;  %970 = vmatpush.msra.mxu1 %v626_v3  ;;  %v956_v31 = vld [vmem:[%s1396_s0 + $0x18] sm:$0xff]   ;;  %v952_v33 = vunpack.c.l.bf16 %v960_v29  ;;  %v928_v34 = vunpack.c.l.bf16 %v954_v30  ;;  %v953_v37 = vunpack.c.h.bf16 %v960_v29  ;;  %v929_v38 = vunpack.c.h.bf16 %v954_v30  ;;  %v570_v41 = vld [vmem:[#allocation2 + $0x50] sm:$0xff]  ;;  %v574_v46 = vld [vmem:[#allocation2 + $0x40] sm:$0xff] }
  0x97   : > { %974 = vmatpush.msra.mxu2 %v625_v4  ;;  %975 = vmatpush.msra.mxu3 %v625_v4  ;;  %v936_v35 = vunpack.c.l.bf16 %v956_v31  ;;  %v937_v39 = vunpack.c.h.bf16 %v956_v31  ;;  %v578_v47 = vld [vmem:[#allocation2 + $0x60] sm:$0xff]  ;;  %v571_v53 = vld [vmem:[#allocation2 + $0x68] sm:$0xff]  ;;  %v579_v59 = vld [vmem:[#allocation2 + $0x70] sm:$0xff] }
  0x98   : > { %634 = vmatpush.msra.mxu0 %v625_v4  ;;  %973 = vmatpush.msra.mxu1 %v625_v4  ;;  %v567_v52 = vld [vmem:[#allocation2] sm:$0xff]  ;;  %v568_v0 = vld [vmem:[#allocation2 + $0x58] sm:$0xff]  ;;  %v572_v1 = vld [vmem:[#allocation2 + $0x8] sm:$0xff] }
  0x99   : > { %977 = vmatpush.msra.mxu2 %v624_v5  ;;  %978 = vmatpush.msra.mxu3 %v624_v5  ;;  %v575_v58 = vld [vmem:[#allocation2 + $0x20] sm:$0xff]  ;;  %v577_v18 = vld [vmem:[#allocation2 + $0x38] sm:$0xff] }
  0x9a   : > { %635 = vmatpush.msra.mxu0 %v624_v5  ;;  %976 = vmatpush.msra.mxu1 %v624_v5 }
  0x9b   : > { %980 = vmatpush.msra.mxu2 %v623_v6  ;;  %981 = vmatpush.msra.mxu3 %v623_v6 }
  0x9c   : > { %636 = vmatpush.msra.mxu0 %v623_v6  ;;  %979 = vmatpush.msra.mxu1 %v623_v6  ;;  %v576_v6 = vld [vmem:[#allocation2 + $0x10] sm:$0xff] }
  0x9d   : > { %983 = vmatpush.msra.mxu2 %v622_v7  ;;  %984 = vmatpush.msra.mxu3 %v622_v7 }
  0x9e   : > { %637 = vmatpush.msra.mxu0 %v622_v7  ;;  %982 = vmatpush.msra.mxu1 %v622_v7  ;;  %v580_v7 = vld [vmem:[#allocation2 + $0x78] sm:$0xff] }
  0x9f   : > { %986 = vmatpush.msra.mxu2 %v621_v8  ;;  %987 = vmatpush.msra.mxu3 %v621_v8 }
  0xa0   : > { %638 = vmatpush.msra.mxu0 %v621_v8  ;;  %985 = vmatpush.msra.mxu1 %v621_v8 }
  0xa1   : > { %989 = vmatpush.msra.mxu2 %v620_v9  ;;  %990 = vmatpush.msra.mxu3 %v620_v9 }
  0xa2   : > { %639 = vmatpush.msra.mxu0 %v620_v9  ;;  %988 = vmatpush.msra.mxu1 %v620_v9 }
  0xa3   : > { %992 = vmatpush.msra.mxu2 %v619_v10  ;;  %993 = vmatpush.msra.mxu3 %v619_v10 }
  0xa4   : > { %640 = vmatpush.msra.mxu0 %v619_v10  ;;  %991 = vmatpush.msra.mxu1 %v619_v10 }
  0xa5   : > { %995 = vmatpush.msra.mxu2 %v618_v11  ;;  %996 = vmatpush.msra.mxu3 %v618_v11 }
  0xa6   : > { %641 = vmatpush.msra.mxu0 %v618_v11  ;;  %994 = vmatpush.msra.mxu1 %v618_v11 }
  0xa7   : > { %998 = vmatpush.msra.mxu2 %v617_v12  ;;  %999 = vmatpush.msra.mxu3 %v617_v12 }
  0xa8   : > { %642 = vmatpush.msra.mxu0 %v617_v12  ;;  %997 = vmatpush.msra.mxu1 %v617_v12  ;;  %v569_v12 = vld [vmem:[#allocation2 + $0x18] sm:$0xff] }
  0xa9   : > { %1001 = vmatpush.msra.mxu2 %v616_v13  ;;  %1002 = vmatpush.msra.mxu3 %v616_v13 }
  0xaa   : > { %643 = vmatpush.msra.mxu0 %v616_v13  ;;  %1000 = vmatpush.msra.mxu1 %v616_v13  ;;  %v573_v13 = vld [vmem:[#allocation2 + $0x48] sm:$0xff] }
  0xab   : > { %1004 = vmatpush.msra.mxu2 %v615_v16  ;;  %1005 = vmatpush.msra.mxu3 %v615_v16 }
  0xac   : > { %644 = vmatpush.msra.mxu0 %v615_v16  ;;  %1003 = vmatpush.msra.mxu1 %v615_v16 }
  0xad   : > { %1007 = vmatpush.msra.mxu2 %v614_v19  ;;  %1008 = vmatpush.msra.mxu3 %v614_v19 }
  0xae   : > { %670 = vmatmul.f32.vlgmr.msra.gmra.mxu2 %v940_v20  ;;  %682 = vmatmul.f32.vlgmr.msra.gmra.mxu3 %v948_v21 }
  0xaf   : > { %645 = vmatpush.msra.mxu0 %v614_v19  ;;  %1006 = vmatpush.msra.mxu1 %v614_v19  ;;  %v581_v19 = vld [vmem:[#allocation2 + $0x28] sm:$0xff] }
  0xb0   : > { %646 = vmatmul.f32.vlgmr.msra.gmra.mxu0 %v924_v22  ;;  %658 = vmatmul.f32.vlgmr.msra.gmra.mxu1 %v932_v23 }
  0xb6   : > { %673 = vmatmul.f32.gmra.mxu2 %v941_v24  ;;  %685 = vmatmul.f32.gmra.mxu3 %v949_v25 }
  0xb8   : > { %649 = vmatmul.f32.gmra.mxu0 %v925_v26  ;;  %661 = vmatmul.f32.gmra.mxu1 %v933_v27 }
  0xbe   : > { %676 = vmatmul.f32.gmra.mxu2 %v944_v32  ;;  %688 = vmatmul.f32.gmra.mxu3 %v952_v33 }
  0xc0   : > { %652 = vmatmul.f32.gmra.mxu0 %v928_v34  ;;  %664 = vmatmul.f32.gmra.mxu1 %v936_v35 }
  0xc6   : > { %679 = vmatmul.f32.gmra.mxu2 %v945_v36  ;;  %691 = vmatmul.f32.gmra.mxu3 %v953_v37 }
  0xc8   : > { %655 = vmatmul.f32.gmra.mxu0 %v929_v38  ;;  %667 = vmatmul.f32.gmra.mxu1 %v937_v39 }
 0x12d   : > { %v647_v42 = vpop.f32.mrf.mxu0  ;;  %v659_v43 = vpop.f32.mrf.mxu1 }
 0x12e   : > { %v695_v44 = vadd.f32 %v647_v42, %v566_v40  ;;  %v699_v45 = vadd.f32 %v659_v43, %v570_v41 }
 0x130   : > { %711 = vst [vmem:[#allocation2 + $0x30] sm:$0xff] %v695_v44 }
 0x131   : > { %715 = vst [vmem:[#allocation2 + $0x50] sm:$0xff] %v699_v45  ;;  %v671_v48 = vpop.f32.mrf.mxu2  ;;  %v683_v49 = vpop.f32.mrf.mxu3 }
 0x132   : > { %v703_v50 = vadd.f32 %v671_v48, %v574_v46  ;;  %v707_v51 = vadd.f32 %v683_v49, %v578_v47 }
 0x134   : > { %719 = vst [vmem:[#allocation2 + $0x40] sm:$0xff] %v703_v50 }
 0x135   : > { %723 = vst [vmem:[#allocation2 + $0x60] sm:$0xff] %v707_v51  ;;  %v650_v54 = vpop.f32.mrf.mxu0  ;;  %v662_v55 = vpop.f32.mrf.mxu1 }
 0x136   : > { %v696_v56 = vadd.f32 %v650_v54, %v567_v52  ;;  %v700_v57 = vadd.f32 %v662_v55, %v571_v53 }
 0x138   : > { %712 = vst [vmem:[#allocation2] sm:$0xff] %v696_v56 }
 0x139   : > { %716 = vst [vmem:[#allocation2 + $0x68] sm:$0xff] %v700_v57  ;;  %v674_v60 = vpop.f32.mrf.mxu2  ;;  %v686_v61 = vpop.f32.mrf.mxu3 }
 0x13a   : > { %v704_v62 = vadd.f32 %v674_v60, %v575_v58  ;;  %v708_v63 = vadd.f32 %v686_v61, %v579_v59 }
 0x13c   : > { %720 = vst [vmem:[#allocation2 + $0x20] sm:$0xff] %v704_v62 }
 0x13d   : > { %724 = vst [vmem:[#allocation2 + $0x70] sm:$0xff] %v708_v63  ;;  %v653_v2 = vpop.f32.mrf.mxu0  ;;  %v665_v3 = vpop.f32.mrf.mxu1 }
 0x13e   : > { %v697_v4 = vadd.f32 %v653_v2, %v568_v0  ;;  %v701_v5 = vadd.f32 %v665_v3, %v572_v1 }
 0x140   : > { %713 = vst [vmem:[#allocation2 + $0x58] sm:$0xff] %v697_v4 }
 0x141   : > { %717 = vst [vmem:[#allocation2 + $0x8] sm:$0xff] %v701_v5  ;;  %v677_v8 = vpop.f32.mrf.mxu2  ;;  %v689_v9 = vpop.f32.mrf.mxu3 }
 0x142   : > { %v705_v10 = vadd.f32 %v677_v8, %v576_v6  ;;  %v709_v11 = vadd.f32 %v689_v9, %v580_v7 }
 0x144   : > { %721 = vst [vmem:[#allocation2 + $0x10] sm:$0xff] %v705_v10 }
 0x145   : > { %725 = vst [vmem:[#allocation2 + $0x78] sm:$0xff] %v709_v11  ;;  %v656_v14 = vpop.f32.mrf.mxu0  ;;  %v668_v15 = vpop.f32.mrf.mxu1 }
 0x146   : > { %v698_v16 = vadd.f32 %v656_v14, %v569_v12  ;;  %v702_v17 = vadd.f32 %v668_v15, %v573_v13 }
 0x148   : > { %714 = vst [vmem:[#allocation2 + $0x18] sm:$0xff] %v698_v16 }
 0x149   : > { %718 = vst [vmem:[#allocation2 + $0x48] sm:$0xff] %v702_v17  ;;  %v680_v20 = vpop.f32.mrf.mxu2  ;;  %v692_v21 = vpop.f32.mrf.mxu3  ;;  %730 = sbr.rel (%p915_p4) target bundleno = 351 (0x15f), region = 157 }
 0x14a   : > { %v706_v22 = vadd.f32 %v680_v20, %v577_v18  ;;  %v710_v23 = vadd.f32 %v692_v21, %v581_v19 }
 0x14c   : > { %722 = vst [vmem:[#allocation2 + $0x38] sm:$0xff] %v706_v22 }
 0x14d   : > { %726 = vst [vmem:[#allocation2 + $0x28] sm:$0xff] %v710_v23 }
 0x14e   : > { %v731_v24 = vld [vmem:[#allocation2 + $0x30] sm:$0xff]  ;;  %v732_v25 = vld [vmem:[#allocation2] sm:$0xff]  ;;  %v733_v26 = vld [vmem:[#allocation2 + $0x58] sm:$0xff] }
 0x14f   : > { %747 = vst [vmem:[%s1394_s9] sm:$0xff] %v731_v24  ;;  %v734_v27 = vld [vmem:[#allocation2 + $0x18] sm:$0xff]  ;;  %v735_v28 = vld [vmem:[#allocation2 + $0x50] sm:$0xff]  ;;  %v736_v29 = vld [vmem:[#allocation2 + $0x68] sm:$0xff] }
 0x150   : > { %748 = vst [vmem:[%s1394_s9 + $0x8] sm:$0xff] %v732_v25  ;;  %v737_v30 = vld [vmem:[#allocation2 + $0x8] sm:$0xff]  ;;  %v739_v32 = vld [vmem:[#allocation2 + $0x40] sm:$0xff]  ;;  %v741_v34 = vld [vmem:[#allocation2 + $0x10] sm:$0xff] }
 0x151   : > { %749 = vst [vmem:[%s1394_s9 + $0x10] sm:$0xff] %v733_v26  ;;  %v738_v31 = vld [vmem:[#allocation2 + $0x48] sm:$0xff]  ;;  %v740_v33 = vld [vmem:[#allocation2 + $0x20] sm:$0xff]  ;;  %v744_v37 = vld [vmem:[#allocation2 + $0x70] sm:$0xff] }
 0x152   : > { %750 = vst [vmem:[%s1394_s9 + $0x18] sm:$0xff] %v734_v27  ;;  %v743_v36 = vld [vmem:[#allocation2 + $0x60] sm:$0xff]  ;;  %v745_v38 = vld [vmem:[#allocation2 + $0x78] sm:$0xff] }
 0x153   : > { %751 = vst [vmem:[%s1394_s9 + $0x20] sm:$0xff] %v735_v28  ;;  %v742_v35 = vld [vmem:[#allocation2 + $0x38] sm:$0xff] }
 0x154   : > { %752 = vst [vmem:[%s1394_s9 + $0x28] sm:$0xff] %v736_v29  ;;  %v746_v39 = vld [vmem:[#allocation2 + $0x28] sm:$0xff] }
 0x155   : > { %753 = vst [vmem:[%s1394_s9 + $0x30] sm:$0xff] %v737_v30 }
 0x156   : > { %754 = vst [vmem:[%s1394_s9 + $0x38] sm:$0xff] %v738_v31 }
 0x157   : > { %755 = vst [vmem:[%s1394_s9 + $0x40] sm:$0xff] %v739_v32 }
 0x158   : > { %756 = vst [vmem:[%s1394_s9 + $0x48] sm:$0xff] %v740_v33 }
 0x159   : > { %757 = vst [vmem:[%s1394_s9 + $0x50] sm:$0xff] %v741_v34 }
 0x15a   : > { %758 = vst [vmem:[%s1394_s9 + $0x58] sm:$0xff] %v742_v35 }
 0x15b   : > { %759 = vst [vmem:[%s1394_s9 + $0x60] sm:$0xff] %v743_v36 }
 0x15c   : > { %760 = vst [vmem:[%s1394_s9 + $0x68] sm:$0xff] %v744_v37 }
 0x15d   : > { %761 = vst [vmem:[%s1394_s9 + $0x70] sm:$0xff] %v745_v38 }
 0x15e   : > { %762 = vst [vmem:[%s1394_s9 + $0x78] sm:$0xff] %v746_v39 }
 0x15f PF: > { %s13_s22 = sadd.s32 1, %s1183_s22   ;;  %s1506_s12 = smov %s1147_s13 }
 0x160   : > { %p10_p5 = scmp.ge.s32.totalorder %s13_s22, 6   ;;  %s1507_s13 = smov %s1295_s7 }
 0x161   : > { %s1508_s14 = smov %s1155_s15  ;;  %s1509_s15 = smov %s1283_s29 }
 0x162   : > { %s1510_s16 = smov %s1163_s17  ;;  %s1511_s17 = smov %s1298_s8 }
 0x163   : > { %s1512_s18 = smov %s1175_s20  ;;  %s1513_s19 = smov %s1179_s21 }
 0x164   : > { %s1514_s20 = smov %s1517_s23  ;;  %s1515_s21 = smov %s1521_s24 }
 0x165   :  { %12 = sbr.rel (!%p10_p5) target bundleno = 10 (0xa), region = 208 }

// kernel: new_convolution.2
= control target key start
LH: loop header
LB: loop body
LE: loop exit
PB: predicated region body
PF: predicated region fallthrough
CT: control target
= control target key end

     0   :  { %s531_s12 = smov 0   ;;  %s741_s0 = inlined_call_operand.vmem [shape: f32[256,128], index: 0, kind: input, shape index: {}]   ;;  %s742_s1 = inlined_call_operand.vmem [shape: f32[128,256], index: 1, kind: input, shape index: {}]   ;;  %s743_s2 = inlined_call_operand.vmem [shape: f32[1,256], index: 2, kind: input, shape index: {}]   ;;  %s744_s3 = inlined_call_operand.vmem [shape: f32[256,256], index: 3, kind: output, shape index: {}]  }
   0x1 LB: > { %s450_s13 = sadd.s32 4294967295, %s509_s12   ;;  %p454_p0 = scmp.ge.s32.totalorder %s509_s12, 1  ;;  %s509_s12 = sphi %s531_s12, %s13_s12  }
   0x2   : > { %p138_p1 = scmp.lt.s32.totalorder %s509_s12, 3 }
   0x4   : > { %p139_p2 = pnand %p454_p0, %p138_p1 }
   0x5   : > { %s455_s21 = sshll.u32 (!%p139_p2), %s450_s13, 4 }
   0x6   : > { %142 = sbr.rel (%p139_p2) target bundleno = 235 (0xeb), region = 32  ;;  %p164_p3 = scmp.lt.s32.totalorder (!%p139_p2), %s455_s21, 31 }
   0xb   : > { %v222_v0 = vld [vmem:[%s742_s1 + $0xf0] sm:$0xff]  ;;  %v223_v1 = vld [vmem:[%s742_s1 + $0xf8] sm:$0xff]  ;;  %v220_v2 = vld [vmem:[%s742_s1 + $0xe0] sm:$0xff]  ;;  %s746_s21 = smov (!%p164_p3, %s455_s21), 31 }
   0xc   : > { %463 = vmatpush.msra.mxu2 %v222_v0  ;;  %479 = vmatpush.msra.mxu3 %v223_v1  ;;  %v221_v3 = vld [vmem:[%s742_s1 + $0xe8] sm:$0xff]  ;;  %v218_v4 = vld [vmem:[%s742_s1 + $0xd0] sm:$0xff]  ;;  %v219_v5 = vld [vmem:[%s742_s1 + $0xd8] sm:$0xff]  ;;  %s456_s16 = sshll.u32 %s746_s21, 3  ;;  %s462_s7 = sshll.u32 %s746_s21, 4 }
   0xd   : > { %230 = vmatpush.msra.mxu0 %v222_v0  ;;  %295 = vmatpush.msra.mxu1 %v223_v1  ;;  %v216_v6 = vld [vmem:[%s742_s1 + $0xc0] sm:$0xff]  ;;  %v217_v7 = vld [vmem:[%s742_s1 + $0xc8] sm:$0xff]  ;;  %v214_v8 = vld [vmem:[%s742_s1 + $0xb0] sm:$0xff]  ;;  %s637_s13 = scalar_lea.vmem %s741_s0, %s456_s16  ;;  %s672_s10 = scalar_lea.vmem %s744_s3, %s462_s7 }
   0xe   : > { %464 = vmatpush.msra.mxu2 %v220_v2  ;;  %480 = vmatpush.msra.mxu3 %v221_v3  ;;  %v215_v9 = vld [vmem:[%s742_s1 + $0xb8] sm:$0xff]  ;;  %v212_v10 = vld [vmem:[%s742_s1 + $0xa0] sm:$0xff]  ;;  %v213_v11 = vld [vmem:[%s742_s1 + $0xa8] sm:$0xff] }
   0xf   : > { %231 = vmatpush.msra.mxu0 %v220_v2  ;;  %296 = vmatpush.msra.mxu1 %v221_v3  ;;  %v210_v12 = vld [vmem:[%s742_s1 + $0x90] sm:$0xff]  ;;  %v211_v13 = vld [vmem:[%s742_s1 + $0x98] sm:$0xff]  ;;  %v208_v14 = vld [vmem:[%s742_s1 + $0x80] sm:$0xff] }
  0x10   : > { %465 = vmatpush.msra.mxu2 %v218_v4  ;;  %481 = vmatpush.msra.mxu3 %v219_v5  ;;  %v209_v15 = vld [vmem:[%s742_s1 + $0x88] sm:$0xff]  ;;  %v206_v16 = vld [vmem:[%s742_s1 + $0x70] sm:$0xff]  ;;  %v207_v17 = vld [vmem:[%s742_s1 + $0x78] sm:$0xff] }
  0x11   : > { %232 = vmatpush.msra.mxu0 %v218_v4  ;;  %297 = vmatpush.msra.mxu1 %v219_v5  ;;  %v204_v18 = vld [vmem:[%s742_s1 + $0x60] sm:$0xff]  ;;  %v205_v19 = vld [vmem:[%s742_s1 + $0x68] sm:$0xff]  ;;  %v202_v20 = vld [vmem:[%s742_s1 + $0x50] sm:$0xff] }
  0x12   : > { %466 = vmatpush.msra.mxu2 %v216_v6  ;;  %482 = vmatpush.msra.mxu3 %v217_v7  ;;  %v203_v21 = vld [vmem:[%s742_s1 + $0x58] sm:$0xff]  ;;  %v200_v22 = vld [vmem:[%s742_s1 + $0x40] sm:$0xff]  ;;  %v201_v23 = vld [vmem:[%s742_s1 + $0x48] sm:$0xff] }
  0x13   : > { %233 = vmatpush.msra.mxu0 %v216_v6  ;;  %298 = vmatpush.msra.mxu1 %v217_v7  ;;  %v198_v24 = vld [vmem:[%s742_s1 + $0x30] sm:$0xff]  ;;  %v199_v25 = vld [vmem:[%s742_s1 + $0x38] sm:$0xff]  ;;  %v196_v26 = vld [vmem:[%s742_s1 + $0x20] sm:$0xff] }
  0x14   : > { %467 = vmatpush.msra.mxu2 %v214_v8  ;;  %483 = vmatpush.msra.mxu3 %v215_v9  ;;  %v197_v27 = vld [vmem:[%s742_s1 + $0x28] sm:$0xff]  ;;  %v194_v28 = vld [vmem:[%s742_s1 + $0x10] sm:$0xff]  ;;  %v195_v29 = vld [vmem:[%s742_s1 + $0x18] sm:$0xff] }
  0x15   : > { %234 = vmatpush.msra.mxu0 %v214_v8  ;;  %299 = vmatpush.msra.mxu1 %v215_v9  ;;  %v192_v30 = vld [vmem:[%s742_s1] sm:$0xff]  ;;  %v193_v31 = vld [vmem:[%s742_s1 + $0x8] sm:$0xff]  ;;  %v186_v36 = vld [vmem:[%s637_s13 + $0x50] sm:$0xff] }
  0x16   : > { %468 = vmatpush.msra.mxu2 %v212_v10  ;;  %484 = vmatpush.msra.mxu3 %v213_v11  ;;  %v184_v32 = vld [vmem:[%s637_s13 + $0x40] sm:$0xff]  ;;  %v185_v34 = vld [vmem:[%s637_s13 + $0x48] sm:$0xff]  ;;  %v178_v37 = vld [vmem:[%s637_s13 + $0x10] sm:$0xff] }
  0x17   : > { %235 = vmatpush.msra.mxu0 %v212_v10  ;;  %300 = vmatpush.msra.mxu1 %v213_v11  ;;  %v176_v33 = vld [vmem:[%s637_s13] sm:$0xff]  ;;  %v177_v35 = vld [vmem:[%s637_s13 + $0x8] sm:$0xff]  ;;  %v187_v38 = vld [vmem:[%s637_s13 + $0x58] sm:$0xff] }
  0x18   : > { %469 = vmatpush.msra.mxu2 %v210_v12  ;;  %485 = vmatpush.msra.mxu3 %v211_v13  ;;  %v179_v39 = vld [vmem:[%s637_s13 + $0x18] sm:$0xff]  ;;  %v188_v40 = vld [vmem:[%s637_s13 + $0x60] sm:$0xff]  ;;  %v189_v42 = vld [vmem:[%s637_s13 + $0x68] sm:$0xff] }
  0x19   : > { %236 = vmatpush.msra.mxu0 %v210_v12  ;;  %301 = vmatpush.msra.mxu1 %v211_v13  ;;  %v180_v41 = vld [vmem:[%s637_s13 + $0x20] sm:$0xff]  ;;  %v181_v43 = vld [vmem:[%s637_s13 + $0x28] sm:$0xff]  ;;  %v190_v44 = vld [vmem:[%s637_s13 + $0x70] sm:$0xff] }
  0x1a   : > { %470 = vmatpush.msra.mxu2 %v208_v14  ;;  %486 = vmatpush.msra.mxu3 %v209_v15  ;;  %v182_v45 = vld [vmem:[%s637_s13 + $0x30] sm:$0xff]  ;;  %v191_v46 = vld [vmem:[%s637_s13 + $0x78] sm:$0xff]  ;;  %v224_v48 = vld [vmem:[%s743_s2] sm:$0x3] }
  0x1b   : > { %237 = vmatpush.msra.mxu0 %v208_v14  ;;  %302 = vmatpush.msra.mxu1 %v209_v15  ;;  %v183_v47 = vld [vmem:[%s637_s13 + $0x38] sm:$0xff]  ;;  %v665_v49 = vperm.slane %v224_v48, 0  ;;  %v667_v50 = vperm.slane %v224_v48, 1 }
  0x1c   : > { %471 = vmatpush.msra.mxu2 %v206_v16  ;;  %487 = vmatpush.msra.mxu3 %v207_v17 }
  0x1d   : > { %238 = vmatpush.msra.mxu0 %v206_v16  ;;  %303 = vmatpush.msra.mxu1 %v207_v17 }
  0x1e   : > { %472 = vmatpush.msra.mxu2 %v204_v18  ;;  %488 = vmatpush.msra.mxu3 %v205_v19 }
  0x1f   : > { %239 = vmatpush.msra.mxu0 %v204_v18  ;;  %304 = vmatpush.msra.mxu1 %v205_v19 }
  0x20   : > { %473 = vmatpush.msra.mxu2 %v202_v20  ;;  %489 = vmatpush.msra.mxu3 %v203_v21 }
  0x21   : > { %240 = vmatpush.msra.mxu0 %v202_v20  ;;  %305 = vmatpush.msra.mxu1 %v203_v21 }
  0x22   : > { %474 = vmatpush.msra.mxu2 %v200_v22  ;;  %490 = vmatpush.msra.mxu3 %v201_v23 }
  0x23   : > { %241 = vmatpush.msra.mxu0 %v200_v22  ;;  %306 = vmatpush.msra.mxu1 %v201_v23 }
  0x24   : > { %475 = vmatpush.msra.mxu2 %v198_v24  ;;  %491 = vmatpush.msra.mxu3 %v199_v25 }
  0x25   : > { %242 = vmatpush.msra.mxu0 %v198_v24  ;;  %307 = vmatpush.msra.mxu1 %v199_v25 }
  0x26   : > { %476 = vmatpush.msra.mxu2 %v196_v26  ;;  %492 = vmatpush.msra.mxu3 %v197_v27 }
  0x27   : > { %243 = vmatpush.msra.mxu0 %v196_v26  ;;  %308 = vmatpush.msra.mxu1 %v197_v27 }
  0x28   : > { %477 = vmatpush.msra.mxu2 %v194_v28  ;;  %493 = vmatpush.msra.mxu3 %v195_v29 }
  0x29   : > { %244 = vmatpush.msra.mxu0 %v194_v28  ;;  %309 = vmatpush.msra.mxu1 %v195_v29 }
  0x2a   : > { %478 = vmatpush.msra.mxu2 %v192_v30  ;;  %494 = vmatpush.msra.mxu3 %v193_v31 }
  0x2b   : > { %270 = vmatmul.f32.vlgmr.msra.gmra.mxu2 %v184_v32  ;;  %335 = vmatmul.f32.vlgmr.msra.gmra.mxu3 %v184_v32 }
  0x2c   : > { %245 = vmatpush.msra.mxu0 %v192_v30  ;;  %310 = vmatpush.msra.mxu1 %v193_v31 }
  0x2d   : > { %246 = vmatmul.f32.vlgmr.msra.gmra.mxu0 %v176_v33  ;;  %311 = vmatmul.f32.vlgmr.msra.gmra.mxu1 %v176_v33 }
  0x33   : > { %273 = vmatmul.f32.gmra.mxu2 %v185_v34  ;;  %338 = vmatmul.f32.gmra.mxu3 %v185_v34 }
  0x35   : > { %249 = vmatmul.f32.gmra.mxu0 %v177_v35  ;;  %314 = vmatmul.f32.gmra.mxu1 %v177_v35 }
  0x3b   : > { %276 = vmatmul.f32.gmra.mxu2 %v186_v36  ;;  %341 = vmatmul.f32.gmra.mxu3 %v186_v36 }
  0x3d   : > { %252 = vmatmul.f32.gmra.mxu0 %v178_v37  ;;  %317 = vmatmul.f32.gmra.mxu1 %v178_v37 }
  0x43   : > { %279 = vmatmul.f32.gmra.mxu2 %v187_v38  ;;  %344 = vmatmul.f32.gmra.mxu3 %v187_v38 }
  0x45   : > { %255 = vmatmul.f32.gmra.mxu0 %v179_v39  ;;  %320 = vmatmul.f32.gmra.mxu1 %v179_v39 }
  0x4b   : > { %282 = vmatmul.f32.gmra.mxu2 %v188_v40  ;;  %347 = vmatmul.f32.gmra.mxu3 %v188_v40 }
  0x4d   : > { %258 = vmatmul.f32.gmra.mxu0 %v180_v41  ;;  %323 = vmatmul.f32.gmra.mxu1 %v180_v41 }
  0x53   : > { %285 = vmatmul.f32.gmra.mxu2 %v189_v42  ;;  %350 = vmatmul.f32.gmra.mxu3 %v189_v42 }
  0x55   : > { %261 = vmatmul.f32.gmra.mxu0 %v181_v43  ;;  %326 = vmatmul.f32.gmra.mxu1 %v181_v43 }
  0x5b   : > { %288 = vmatmul.f32.gmra.mxu2 %v190_v44  ;;  %353 = vmatmul.f32.gmra.mxu3 %v190_v44 }
  0x5d   : > { %264 = vmatmul.f32.gmra.mxu0 %v182_v45  ;;  %329 = vmatmul.f32.gmra.mxu1 %v182_v45 }
  0x63   : > { %291 = vmatmul.f32.gmra.mxu2 %v191_v46  ;;  %356 = vmatmul.f32.gmra.mxu3 %v191_v46 }
  0x65   : > { %267 = vmatmul.f32.gmra.mxu0 %v183_v47  ;;  %332 = vmatmul.f32.gmra.mxu1 %v183_v47 }
  0xaa   : > { %v247_v51 = vpop.f32.mrf.mxu0  ;;  %v312_v52 = vpop.f32.mrf.mxu1 }
  0xab   : > { %v248_v53 = vadd.f32 %v247_v51, %v665_v49  ;;  %v313_v54 = vadd.f32 %v312_v52, %v667_v50 }
  0xad   : > { %360 = vst [vmem:[%s672_s10] sm:$0xff] %v248_v53 }
  0xae   : > { %v271_v55 = vpop.f32.mrf.mxu2  ;;  %361 = vst [vmem:[%s672_s10 + $0x8] sm:$0xff] %v313_v54  ;;  %v336_v56 = vpop.f32.mrf.mxu3 }
  0xaf   : > { %v272_v57 = vadd.f32 %v271_v55, %v665_v49  ;;  %v337_v58 = vadd.f32 %v336_v56, %v667_v50 }
  0xb1   : > { %376 = vst [vmem:[%s672_s10 + $0x80] sm:$0xff] %v272_v57 }
  0xb2   : > { %377 = vst [vmem:[%s672_s10 + $0x88] sm:$0xff] %v337_v58  ;;  %v250_v59 = vpop.f32.mrf.mxu0  ;;  %v315_v60 = vpop.f32.mrf.mxu1 }
  0xb3   : > { %v251_v61 = vadd.f32 %v250_v59, %v665_v49  ;;  %v316_v62 = vadd.f32 %v315_v60, %v667_v50 }
  0xb5   : > { %362 = vst [vmem:[%s672_s10 + $0x10] sm:$0xff] %v251_v61 }
  0xb6   : > { %v274_v63 = vpop.f32.mrf.mxu2  ;;  %363 = vst [vmem:[%s672_s10 + $0x18] sm:$0xff] %v316_v62  ;;  %v339_v0 = vpop.f32.mrf.mxu3 }
  0xb7   : > { %v275_v1 = vadd.f32 %v274_v63, %v665_v49  ;;  %v340_v2 = vadd.f32 %v339_v0, %v667_v50 }
  0xb9   : > { %378 = vst [vmem:[%s672_s10 + $0x90] sm:$0xff] %v275_v1 }
  0xba   : > { %379 = vst [vmem:[%s672_s10 + $0x98] sm:$0xff] %v340_v2  ;;  %v253_v3 = vpop.f32.mrf.mxu0  ;;  %v318_v4 = vpop.f32.mrf.mxu1 }
  0xbb   : > { %v254_v5 = vadd.f32 %v253_v3, %v665_v49  ;;  %v319_v6 = vadd.f32 %v318_v4, %v667_v50 }
  0xbd   : > { %364 = vst [vmem:[%s672_s10 + $0x20] sm:$0xff] %v254_v5 }
  0xbe   : > { %v277_v7 = vpop.f32.mrf.mxu2  ;;  %365 = vst [vmem:[%s672_s10 + $0x28] sm:$0xff] %v319_v6  ;;  %v342_v8 = vpop.f32.mrf.mxu3 }
  0xbf   : > { %v278_v9 = vadd.f32 %v277_v7, %v665_v49  ;;  %v343_v10 = vadd.f32 %v342_v8, %v667_v50 }
  0xc1   : > { %380 = vst [vmem:[%s672_s10 + $0xa0] sm:$0xff] %v278_v9 }
  0xc2   : > { %381 = vst [vmem:[%s672_s10 + $0xa8] sm:$0xff] %v343_v10  ;;  %v256_v11 = vpop.f32.mrf.mxu0  ;;  %v321_v12 = vpop.f32.mrf.mxu1 }
  0xc3   : > { %v257_v13 = vadd.f32 %v256_v11, %v665_v49  ;;  %v322_v14 = vadd.f32 %v321_v12, %v667_v50 }
  0xc5   : > { %366 = vst [vmem:[%s672_s10 + $0x30] sm:$0xff] %v257_v13 }
  0xc6   : > { %v280_v15 = vpop.f32.mrf.mxu2  ;;  %367 = vst [vmem:[%s672_s10 + $0x38] sm:$0xff] %v322_v14  ;;  %v345_v16 = vpop.f32.mrf.mxu3 }
  0xc7   : > { %v281_v17 = vadd.f32 %v280_v15, %v665_v49  ;;  %v346_v18 = vadd.f32 %v345_v16, %v667_v50 }
  0xc9   : > { %382 = vst [vmem:[%s672_s10 + $0xb0] sm:$0xff] %v281_v17 }
  0xca   : > { %383 = vst [vmem:[%s672_s10 + $0xb8] sm:$0xff] %v346_v18  ;;  %v259_v19 = vpop.f32.mrf.mxu0  ;;  %v324_v20 = vpop.f32.mrf.mxu1 }
  0xcb   : > { %v260_v21 = vadd.f32 %v259_v19, %v665_v49  ;;  %v325_v22 = vadd.f32 %v324_v20, %v667_v50 }
  0xcd   : > { %368 = vst [vmem:[%s672_s10 + $0x40] sm:$0xff] %v260_v21 }
  0xce   : > { %v283_v23 = vpop.f32.mrf.mxu2  ;;  %369 = vst [vmem:[%s672_s10 + $0x48] sm:$0xff] %v325_v22  ;;  %v348_v24 = vpop.f32.mrf.mxu3 }
  0xcf   : > { %v284_v25 = vadd.f32 %v283_v23, %v665_v49  ;;  %v349_v26 = vadd.f32 %v348_v24, %v667_v50 }
  0xd1   : > { %384 = vst [vmem:[%s672_s10 + $0xc0] sm:$0xff] %v284_v25 }
  0xd2   : > { %385 = vst [vmem:[%s672_s10 + $0xc8] sm:$0xff] %v349_v26  ;;  %v262_v27 = vpop.f32.mrf.mxu0  ;;  %v327_v28 = vpop.f32.mrf.mxu1 }
  0xd3   : > { %v263_v29 = vadd.f32 %v262_v27, %v665_v49  ;;  %v328_v30 = vadd.f32 %v327_v28, %v667_v50 }
  0xd5   : > { %370 = vst [vmem:[%s672_s10 + $0x50] sm:$0xff] %v263_v29 }
  0xd6   : > { %v286_v31 = vpop.f32.mrf.mxu2  ;;  %371 = vst [vmem:[%s672_s10 + $0x58] sm:$0xff] %v328_v30  ;;  %v351_v32 = vpop.f32.mrf.mxu3 }
  0xd7   : > { %v287_v33 = vadd.f32 %v286_v31, %v665_v49  ;;  %v352_v34 = vadd.f32 %v351_v32, %v667_v50 }
  0xd9   : > { %386 = vst [vmem:[%s672_s10 + $0xd0] sm:$0xff] %v287_v33 }
  0xda   : > { %387 = vst [vmem:[%s672_s10 + $0xd8] sm:$0xff] %v352_v34  ;;  %v265_v35 = vpop.f32.mrf.mxu0  ;;  %v330_v36 = vpop.f32.mrf.mxu1 }
  0xdb   : > { %v266_v37 = vadd.f32 %v265_v35, %v665_v49  ;;  %v331_v38 = vadd.f32 %v330_v36, %v667_v50 }
  0xdd   : > { %372 = vst [vmem:[%s672_s10 + $0x60] sm:$0xff] %v266_v37 }
  0xde   : > { %v289_v39 = vpop.f32.mrf.mxu2  ;;  %373 = vst [vmem:[%s672_s10 + $0x68] sm:$0xff] %v331_v38  ;;  %v354_v40 = vpop.f32.mrf.mxu3 }
  0xdf   : > { %v290_v41 = vadd.f32 %v289_v39, %v665_v49  ;;  %v355_v42 = vadd.f32 %v354_v40, %v667_v50 }
  0xe1   : > { %388 = vst [vmem:[%s672_s10 + $0xe0] sm:$0xff] %v290_v41 }
  0xe2   : > { %389 = vst [vmem:[%s672_s10 + $0xe8] sm:$0xff] %v355_v42  ;;  %v268_v43 = vpop.f32.mrf.mxu0  ;;  %v333_v44 = vpop.f32.mrf.mxu1 }
  0xe3   : > { %v269_v45 = vadd.f32 %v268_v43, %v665_v49  ;;  %v334_v46 = vadd.f32 %v333_v44, %v667_v50 }
  0xe5   : > { %374 = vst [vmem:[%s672_s10 + $0x70] sm:$0xff] %v269_v45 }
  0xe6   : > { %v292_v47 = vpop.f32.mrf.mxu2  ;;  %375 = vst [vmem:[%s672_s10 + $0x78] sm:$0xff] %v334_v46  ;;  %v357_v48 = vpop.f32.mrf.mxu3 }
  0xe7   : > { %v293_v51 = vadd.f32 %v292_v47, %v665_v49  ;;  %v358_v52 = vadd.f32 %v357_v48, %v667_v50 }
  0xe9   : > { %390 = vst [vmem:[%s672_s10 + $0xf0] sm:$0xff] %v293_v51 }
  0xea   : > { %391 = vst [vmem:[%s672_s10 + $0xf8] sm:$0xff] %v358_v52 }
  0xeb PF: > { %s13_s12 = sadd.s32 1, %s509_s12  }
  0xec   : > { %p10_p4 = scmp.ge.s32.totalorder %s13_s12, 4  }
  0xee   :  { %12 = sbr.rel (!%p10_p4) target bundleno = 1 (0x1), region = 62 }

</bundles_post_ra>
